<compile_context>
chip_gen: v6e
topology: v6e:2x2x1
jax: 0.10.0
libtpu: 0.0.40
codegen_flags: <defaults>
</compile_context>

<pallas_src>
import numpy as np
import jax
import jax.numpy as jnp
from jax.experimental import pallas as pl
from jax.experimental.pallas import tpu as pltpu

IGNORE_INDEX = 255


# --------------------------------------------------------------------------
# helpers
# --------------------------------------------------------------------------
def _round_up(x, m):
    return ((x + m - 1) // m) * m


def _largest_divisor_leq(n, limit):
    for t in range(min(limit, n), 0, -1):
        if n % t == 0:
            return t
    return 1


def _interp_matrix(dst, src):
    """1-D align_corners=True bilinear interpolation matrix (dst, src)."""
    A = np.zeros((dst, src), np.float32)
    for i in range(dst):
        pos = 0.0 if dst == 1 else i * (src - 1) / (dst - 1)
        lo = int(np.floor(pos))
        hi = min(lo + 1, src - 1)
        w = pos - lo
        A[i, lo] += 1.0 - w
        A[i, hi] += w
    return A


# --------------------------------------------------------------------------
# Pallas kernel: separable bilinear upsample (NCHW -> NCHW, bf16 out).
# Per batch*channel slice:  out = (Ah @ x) @ Aw^T   (two small matmuls).
# --------------------------------------------------------------------------
def _upsample_kernel(x_ref, ah_ref, awt_ref, o_ref):
    ah = ah_ref[...]                                   # (H, Hs)  bf16
    awt = awt_ref[...]                                 # (Ws, W)  bf16
    tbc = x_ref.shape[0]
    for b in range(tbc):                               # static unroll, tbc small
        # height pass: (H, Hs) @ (Hs, Ws) -> (H, Ws), f32 accumulate
        t = jnp.dot(ah, x_ref[b], preferred_element_type=jnp.float32)
        # width pass: (H, Ws) @ (Ws, W) -> (H, W), f32 accumulate
        o_ref[b] = jnp.dot(t.astype(jnp.bfloat16), awt,
                           preferred_element_type=jnp.float32).astype(o_ref.dtype)


def bilinear_upsample(x_nchw, H, W, bc_tile=8):
    """F.interpolate(x, size=(H, W), mode='bilinear', align_corners=True)."""
    B, C, Hs, Ws = x_nchw.shape
    BC = B * C
    Ah = jnp.asarray(_interp_matrix(H, Hs), jnp.bfloat16)      # (H, Hs)
    AwT = jnp.asarray(_interp_matrix(W, Ws).T, jnp.bfloat16)   # (Ws, W)
    x_flat = x_nchw.reshape(BC, Hs, Ws).astype(jnp.bfloat16)
    tbc = _largest_divisor_leq(BC, bc_tile)

    out = pl.pallas_call(
        _upsample_kernel,
        out_shape=jax.ShapeDtypeStruct((BC, H, W), jnp.bfloat16),
        grid=(BC // tbc,),
        in_specs=[pl.BlockSpec((tbc, Hs, Ws), lambda i: (i, 0, 0)),
                  pl.BlockSpec((H, Hs), lambda i: (0, 0)),
                  pl.BlockSpec((Ws, W), lambda i: (0, 0))],
        out_specs=pl.BlockSpec((tbc, H, W), lambda i: (i, 0, 0)),
        compiler_params=pltpu.CompilerParams(
            dimension_semantics=("parallel",)),
    )(x_flat, Ah, AwT)
    return out.reshape(B, C, H, W)


# --------------------------------------------------------------------------
# Pallas kernel: class-weighted cross-entropy with ignore_index, mean reduce.
# Layout: channels on sublanes, pixels on lanes  (block (1, C, TPIX)).
# Accumulates per-lane partial sums in VMEM scratch; writes the per-batch
# (lsum, wsum) scalars only on the last pixel tile.
# --------------------------------------------------------------------------
def _ce_kernel(logits_ref, labels_ref, w_ref, lsum_ref, wsum_ref, l_acc, w_acc):
    t = pl.program_id(1)
    nt = pl.num_programs(1)

    @pl.when(t == 0)
    def _():
        l_acc[...] = jnp.zeros_like(l_acc)
        w_acc[...] = jnp.zeros_like(w_acc)

    logits = logits_ref[0].astype(jnp.float32)             # (C, TPIX)
    labels = labels_ref[0]                                  # (1, TPIX) int32
    w = w_ref[...]                                          # (C, 1) f32

    m = jnp.max(logits, axis=0, keepdims=True)              # (1, TPIX)
    lse = jnp.log(jnp.sum(jnp.exp(logits - m), axis=0, keepdims=True))

    cls = jax.lax.broadcasted_iota(jnp.int32, logits.shape, 0)
    onehot = (cls == labels).astype(jnp.float32)            # (C, TPIX)
    logit_y = jnp.sum(logits * onehot, axis=0, keepdims=True)   # (1, TPIX)
    w_y = jnp.sum(w * onehot, axis=0, keepdims=True)            # (1, TPIX)
    valid = (labels != IGNORE_INDEX).astype(jnp.float32)        # (1, TPIX)

    nll = m + lse - logit_y                                 # = -log p[y]
    l_acc[...] = l_acc[...] + nll * w_y * valid
    w_acc[...] = w_acc[...] + w_y * valid

    @pl.when(t == nt - 1)
    def _():
        lsum_ref[...] = jnp.sum(l_acc[...], axis=1, keepdims=True)[None]
        wsum_ref[...] = jnp.sum(w_acc[...], axis=1, keepdims=True)[None]


def cross_entropy_mean(logits_bchw, labels_bhw, class_weights, tpix_max=2048):
    """torch.nn.functional.cross_entropy(logits, labels, weight, ignore_index=255)."""
    B, C, H, W = logits_bchw.shape
    HW = H * W
    tpix = min(tpix_max, _round_up(HW, 128))                # lane-dense tile
    HWp = _round_up(HW, tpix)
    pad = HWp - HW

    logits = logits_bchw.reshape(B, C, HW)                  # keep bf16 (no upcast)
    labels = labels_bhw.reshape(B, 1, HW).astype(jnp.int32)
    if pad:
        logits = jnp.pad(logits, ((0, 0), (0, 0), (0, pad)))
        labels = jnp.pad(labels, ((0, 0), (0, 0), (0, pad)),
                         constant_values=IGNORE_INDEX)
    w = class_weights.reshape(C, 1).astype(jnp.float32)

    lsum, wsum = pl.pallas_call(
        _ce_kernel,
        out_shape=(jax.ShapeDtypeStruct((B, 1, 1), jnp.float32),
                   jax.ShapeDtypeStruct((B, 1, 1), jnp.float32)),
        grid=(B, HWp // tpix),
        in_specs=[pl.BlockSpec((1, C, tpix), lambda b, t: (b, 0, t)),
                  pl.BlockSpec((1, 1, tpix), lambda b, t: (b, 0, t)),
                  pl.BlockSpec((C, 1), lambda b, t: (0, 0))],
        out_specs=(pl.BlockSpec((1, 1, 1), lambda b, t: (b, 0, 0)),
                   pl.BlockSpec((1, 1, 1), lambda b, t: (b, 0, 0))),
        scratch_shapes=[pltpu.VMEM((1, tpix), jnp.float32),
                        pltpu.VMEM((1, tpix), jnp.float32)],
        compiler_params=pltpu.CompilerParams(
            dimension_semantics=("parallel", "arbitrary")),
    )(logits, labels, w)
    return jnp.sum(lsum) / jnp.sum(wsum)


# --------------------------------------------------------------------------
# Lovasz-Softmax (classes='present', per_image=False, ignore=255), plain JAX.
# TODO(synk): LovaszSoftmax class source not provided; standard sort-based
# Jaccard surrogate is used here (argsort/cumsum have no clean Pallas form).
# --------------------------------------------------------------------------
def lovasz_softmax(logits_bchw, labels_bhw, ignore=IGNORE_INDEX):
    B, C, H, W = logits_bchw.shape
    probas = jax.nn.softmax(logits_bchw.astype(jnp.float32), axis=1)
    probas_cf = jnp.moveaxis(probas, 1, 0).reshape(C, -1)      # (C, N) channels-first
    labels = labels_bhw.reshape(-1)
    valid = labels != ignore
    validf = valid.astype(jnp.float32)

    def per_class(c):
        fg = ((labels == c) & valid).astype(jnp.float32)
        errors = jnp.abs(fg - probas_cf[c]) * validf           # ignored pixels -> 0
        order = jnp.argsort(-errors)
        e_sorted = errors[order]
        fg_sorted = fg[order]
        gts = jnp.sum(fg_sorted)
        inter = gts - jnp.cumsum(fg_sorted)
        union = gts + jnp.cumsum(1.0 - fg_sorted)
        jac = 1.0 - inter / union
        grad = jnp.concatenate([jac[:1], jac[1:] - jac[:-1]])
        return jnp.dot(e_sorted, grad), (gts > 0).astype(jnp.float32)

    losses, present = jax.vmap(per_class)(jnp.arange(C))
    denom = jnp.maximum(jnp.sum(present), 1.0)
    return jnp.sum(losses * present) / denom


# --------------------------------------------------------------------------
# CriterionAll.forward
#   preds  = [preds_parsing (list of 4 NCHW logits), preds_edge, preds_fg]
#   target = [target_parsing (B,H,W) int, target_edge (B,H,W) int]
# --------------------------------------------------------------------------
def criterion_all_forward(preds, target, num_classes=20, ignore_index=IGNORE_INDEX,
                          with_edge=True, with_lovasz_loss=True):
    target_parsing, target_edge = target
    B, H, W = target_parsing.shape
    preds_parsing, preds_edge, preds_fg = preds

    total = jnp.float32(0.0)
    ones_par = jnp.ones((num_classes,), jnp.float32)

    parsing_details = []
    for p in preds_parsing:
        up = bilinear_upsample(p, H, W)                         # (B,C,H,W) bf16
        ce = cross_entropy_mean(up, target_parsing, ones_par)
        if with_lovasz_loss:
            lv = lovasz_softmax(up, target_parsing, ignore_index)
            pli = 0.5 * ce + 0.5 * lv
        else:
            pli = ce
        total = total + pli
        parsing_details.append(pli)

    edge_loss = None
    if with_edge:
        pos_num = jnp.sum((target_edge == 1).astype(jnp.float32))
        neg_num = jnp.sum((target_edge == 0).astype(jnp.float32))
        weight_pos = neg_num / (pos_num + neg_num)
        weight_neg = pos_num / (pos_num + neg_num)
        edge_weights = jnp.stack([weight_neg, weight_pos])
        up_e = bilinear_upsample(preds_edge, H, W)
        edge_loss = cross_entropy_mean(up_e, target_edge, edge_weights)
        total = total + edge_loss

    # foreground / saliency branch
    up_fg = bilinear_upsample(preds_fg, H, W)
    tp = target_parsing
    target_sal = jnp.where((tp > 0) & (tp != ignore_index), 1, tp).astype(jnp.int32)
    fg_loss = cross_entropy_mean(up_fg, target_sal, jnp.ones((2,), jnp.float32))
    total = total + fg_loss

    if with_edge:
        return (total, edge_loss, fg_loss,
                parsing_details[0], parsing_details[1],
                parsing_details[2], parsing_details[3])
    return (total, fg_loss)


if __name__ == "__main__":
    key = jax.random.PRNGKey(0)
    ks = jax.random.split(key, 9)

    B, C, H, W = 2, 20, 16, 16

    preds_parsing = [
        jax.random.normal(ks[0], (B, C, 8, 8), jnp.float32),
        jax.random.normal(ks[1], (B, C, 8, 8), jnp.float32),
        jax.random.normal(ks[2], (B, C, 16, 16), jnp.float32),
        jax.random.normal(ks[3], (B, C, 8, 8), jnp.float32),
    ]
    preds_edge = jax.random.normal(ks[4], (B, 2, 8, 8), jnp.float32)
    preds_fg = jax.random.normal(ks[5], (B, 2, 8, 8), jnp.float32)

    target_parsing = jax.random.randint(ks[6], (B, H, W), 0, C).astype(jnp.int32)
    ign = jax.random.bernoulli(ks[7], 0.05, (B, H, W))
    target_parsing = jnp.where(ign, IGNORE_INDEX, target_parsing).astype(jnp.int32)

    target_edge = jax.random.randint(ks[8], (B, H, W), 0, 2).astype(jnp.int32)
    target_edge = jnp.where(ign, IGNORE_INDEX, target_edge).astype(jnp.int32)

    preds = [preds_parsing, preds_edge, preds_fg]
    target = [target_parsing, target_edge]

    out = criterion_all_forward(preds, target, num_classes=C)
    out = jax.block_until_ready(out)
    total = float(out[0])
    assert np.isfinite(total)
    print("KERNEL_OK")
</pallas_src>

<mosaic_0001>
module attributes {stable_mosaic.version = 11 : i64} {
  func.func @_upsample_kernel(%arg0: i32, %arg1: memref<8x8x8xbf16, #tpu.memory_space<vmem>>, %arg2: memref<16x8xbf16, #tpu.memory_space<vmem>>, %arg3: memref<8x16xbf16, #tpu.memory_space<vmem>>, %arg4: memref<8x16x16xbf16, #tpu.memory_space<vmem>>) attributes {dimension_semantics = [#tpu.dimension_semantics<parallel>], iteration_bounds = array<i64: 5>, scalar_prefetch = 0 : i64, scratch_operands = 0 : i64, tpu.core_type = #tpu.core_type<tc>, window_params = [{transform_indices = @transform_0, window_bounds = array<i64: 8, 8, 8>}, {pipeline_mode = #tpu.pipeline_mode<synchronous>, transform_indices = @transform_1, window_bounds = array<i64: 16, 8>}, {pipeline_mode = #tpu.pipeline_mode<synchronous>, transform_indices = @transform_2, window_bounds = array<i64: 8, 16>}, {transform_indices = @transform_3, window_bounds = array<i64: 8, 16, 16>}]} {
    %c0 = arith.constant 0 : index
    %c0_0 = arith.constant 0 : index
    %0 = vector.load %arg2[%c0, %c0_0] : memref<16x8xbf16, #tpu.memory_space<vmem>>, vector<16x8xbf16>
    %c0_1 = arith.constant 0 : index
    %c0_2 = arith.constant 0 : index
    %1 = vector.load %arg3[%c0_1, %c0_2] : memref<8x16xbf16, #tpu.memory_space<vmem>>, vector<8x16xbf16>
    %c0_3 = arith.constant 0 : index
    %c0_4 = arith.constant 0 : index
    %c0_5 = arith.constant 0 : index
    %2 = vector.load %arg1[%c0_3, %c0_4, %c0_5] : memref<8x8x8xbf16, #tpu.memory_space<vmem>>, vector<1x8x8xbf16>
    %3 = vector.shape_cast %2 : vector<1x8x8xbf16> to vector<8x8xbf16>
    %cst = arith.constant dense<0.000000e+00> : vector<16x8xf32>
    %4 = tpu.matmul %0, %3, %cst {dimension_numbers = #tpu.dot_dimension_numbers<[1], [0], [0], [1], [0, 0, 1, 1], [], []>} : vector<16x8xbf16>, vector<8x8xbf16>, vector<16x8xf32> -> vector<16x8xf32>
    %5 = arith.truncf %4 : vector<16x8xf32> to vector<16x8xbf16>
    %cst_6 = arith.constant dense<0.000000e+00> : vector<16x16xf32>
    %6 = tpu.matmul %5, %1, %cst_6 {dimension_numbers = #tpu.dot_dimension_numbers<[1], [0], [0], [1], [0, 0, 1, 1], [], []>} : vector<16x8xbf16>, vector<8x16xbf16>, vector<16x16xf32> -> vector<16x16xf32>
    %7 = arith.truncf %6 : vector<16x16xf32> to vector<16x16xbf16>
    %c0_7 = arith.constant 0 : index
    %c0_8 = arith.constant 0 : index
    %c0_9 = arith.constant 0 : index
    %8 = vector.load %arg4[%c0_7, %c0_8, %c0_9] : memref<8x16x16xbf16, #tpu.memory_space<vmem>>, vector<1x16x16xbf16>
    %9 = vector.shape_cast %8 : vector<1x16x16xbf16> to vector<16x16xbf16>
    %10 = vector.shape_cast %7 : vector<16x16xbf16> to vector<1x16x16xbf16>
    tpu.vector_store %arg4[%c0_7, %c0_8, %c0_9], %10 {strides = array<i32>} : memref<8x16x16xbf16, #tpu.memory_space<vmem>>, vector<1x16x16xbf16>,
    %c1 = arith.constant 1 : index
    %c0_10 = arith.constant 0 : index
    %c0_11 = arith.constant 0 : index
    %11 = vector.load %arg1[%c1, %c0_10, %c0_11] : memref<8x8x8xbf16, #tpu.memory_space<vmem>>, vector<1x8x8xbf16>
    %12 = vector.shape_cast %11 : vector<1x8x8xbf16> to vector<8x8xbf16>
    %cst_12 = arith.constant dense<0.000000e+00> : vector<16x8xf32>
    %13 = tpu.matmul %0, %12, %cst_12 {dimension_numbers = #tpu.dot_dimension_numbers<[1], [0], [0], [1], [0, 0, 1, 1], [], []>} : vector<16x8xbf16>, vector<8x8xbf16>, vector<16x8xf32> -> vector<16x8xf32>
    %14 = arith.truncf %13 : vector<16x8xf32> to vector<16x8xbf16>
    %cst_13 = arith.constant dense<0.000000e+00> : vector<16x16xf32>
    %15 = tpu.matmul %14, %1, %cst_13 {dimension_numbers = #tpu.dot_dimension_numbers<[1], [0], [0], [1], [0, 0, 1, 1], [], []>} : vector<16x8xbf16>, vector<8x16xbf16>, vector<16x16xf32> -> vector<16x16xf32>
    %16 = arith.truncf %15 : vector<16x16xf32> to vector<16x16xbf16>
    %c1_14 = arith.constant 1 : index
    %c0_15 = arith.constant 0 : index
    %c0_16 = arith.constant 0 : index
    %17 = vector.load %arg4[%c1_14, %c0_15, %c0_16] : memref<8x16x16xbf16, #tpu.memory_space<vmem>>, vector<1x16x16xbf16>
    %18 = vector.shape_cast %17 : vector<1x16x16xbf16> to vector<16x16xbf16>
    %19 = vector.shape_cast %16 : vector<16x16xbf16> to vector<1x16x16xbf16>
    tpu.vector_store %arg4[%c1_14, %c0_15, %c0_16], %19 {strides = array<i32>} : memref<8x16x16xbf16, #tpu.memory_space<vmem>>, vector<1x16x16xbf16>,
    %c2 = arith.constant 2 : index
    %c0_17 = arith.constant 0 : index
    %c0_18 = arith.constant 0 : index
    %20 = vector.load %arg1[%c2, %c0_17, %c0_18] : memref<8x8x8xbf16, #tpu.memory_space<vmem>>, vector<1x8x8xbf16>
    %21 = vector.shape_cast %20 : vector<1x8x8xbf16> to vector<8x8xbf16>
    %cst_19 = arith.constant dense<0.000000e+00> : vector<16x8xf32>
    %22 = tpu.matmul %0, %21, %cst_19 {dimension_numbers = #tpu.dot_dimension_numbers<[1], [0], [0], [1], [0, 0, 1, 1], [], []>} : vector<16x8xbf16>, vector<8x8xbf16>, vector<16x8xf32> -> vector<16x8xf32>
    %23 = arith.truncf %22 : vector<16x8xf32> to vector<16x8xbf16>
    %cst_20 = arith.constant dense<0.000000e+00> : vector<16x16xf32>
    %24 = tpu.matmul %23, %1, %cst_20 {dimension_numbers = #tpu.dot_dimension_numbers<[1], [0], [0], [1], [0, 0, 1, 1], [], []>} : vector<16x8xbf16>, vector<8x16xbf16>, vector<16x16xf32> -> vector<16x16xf32>
    %25 = arith.truncf %24 : vector<16x16xf32> to vector<16x16xbf16>
    %c2_21 = arith.constant 2 : index
    %c0_22 = arith.constant 0 : index
    %c0_23 = arith.constant 0 : index
    %26 = vector.load %arg4[%c2_21, %c0_22, %c0_23] : memref<8x16x16xbf16, #tpu.memory_space<vmem>>, vector<1x16x16xbf16>
    %27 = vector.shape_cast %26 : vector<1x16x16xbf16> to vector<16x16xbf16>
    %28 = vector.shape_cast %25 : vector<16x16xbf16> to vector<1x16x16xbf16>
    tpu.vector_store %arg4[%c2_21, %c0_22, %c0_23], %28 {strides = array<i32>} : memref<8x16x16xbf16, #tpu.memory_space<vmem>>, vector<1x16x16xbf16>,
    %c3 = arith.constant 3 : index
    %c0_24 = arith.constant 0 : index
    %c0_25 = arith.constant 0 : index
    %29 = vector.load %arg1[%c3, %c0_24, %c0_25] : memref<8x8x8xbf16, #tpu.memory_space<vmem>>, vector<1x8x8xbf16>
    %30 = vector.shape_cast %29 : vector<1x8x8xbf16> to vector<8x8xbf16>
    %cst_26 = arith.constant dense<0.000000e+00> : vector<16x8xf32>
    %31 = tpu.matmul %0, %30, %cst_26 {dimension_numbers = #tpu.dot_dimension_numbers<[1], [0], [0], [1], [0, 0, 1, 1], [], []>} : vector<16x8xbf16>, vector<8x8xbf16>, vector<16x8xf32> -> vector<16x8xf32>
    %32 = arith.truncf %31 : vector<16x8xf32> to vector<16x8xbf16>
    %cst_27 = arith.constant dense<0.000000e+00> : vector<16x16xf32>
    %33 = tpu.matmul %32, %1, %cst_27 {dimension_numbers = #tpu.dot_dimension_numbers<[1], [0], [0], [1], [0, 0, 1, 1], [], []>} : vector<16x8xbf16>, vector<8x16xbf16>, vector<16x16xf32> -> vector<16x16xf32>
    %34 = arith.truncf %33 : vector<16x16xf32> to vector<16x16xbf16>
    %c3_28 = arith.constant 3 : index
    %c0_29 = arith.constant 0 : index
    %c0_30 = arith.constant 0 : index
    %35 = vector.load %arg4[%c3_28, %c0_29, %c0_30] : memref<8x16x16xbf16, #tpu.memory_space<vmem>>, vector<1x16x16xbf16>
    %36 = vector.shape_cast %35 : vector<1x16x16xbf16> to vector<16x16xbf16>
    %37 = vector.shape_cast %34 : vector<16x16xbf16> to vector<1x16x16xbf16>
    tpu.vector_store %arg4[%c3_28, %c0_29, %c0_30], %37 {strides = array<i32>} : memref<8x16x16xbf16, #tpu.memory_space<vmem>>, vector<1x16x16xbf16>,
    %c4 = arith.constant 4 : index
    %c0_31 = arith.constant 0 : index
    %c0_32 = arith.constant 0 : index
    %38 = vector.load %arg1[%c4, %c0_31, %c0_32] : memref<8x8x8xbf16, #tpu.memory_space<vmem>>, vector<1x8x8xbf16>
    %39 = vector.shape_cast %38 : vector<1x8x8xbf16> to vector<8x8xbf16>
    %cst_33 = arith.constant dense<0.000000e+00> : vector<16x8xf32>
    %40 = tpu.matmul %0, %39, %cst_33 {dimension_numbers = #tpu.dot_dimension_numbers<[1], [0], [0], [1], [0, 0, 1, 1], [], []>} : vector<16x8xbf16>, vector<8x8xbf16>, vector<16x8xf32> -> vector<16x8xf32>
    %41 = arith.truncf %40 : vector<16x8xf32> to vector<16x8xbf16>
    %cst_34 = arith.constant dense<0.000000e+00> : vector<16x16xf32>
    %42 = tpu.matmul %41, %1, %cst_34 {dimension_numbers = #tpu.dot_dimension_numbers<[1], [0], [0], [1], [0, 0, 1, 1], [], []>} : vector<16x8xbf16>, vector<8x16xbf16>, vector<16x16xf32> -> vector<16x16xf32>
    %43 = arith.truncf %42 : vector<16x16xf32> to vector<16x16xbf16>
    %c4_35 = arith.constant 4 : index
    %c0_36 = arith.constant 0 : index
    %c0_37 = arith.constant 0 : index
    %44 = vector.load %arg4[%c4_35, %c0_36, %c0_37] : memref<8x16x16xbf16, #tpu.memory_space<vmem>>, vector<1x16x16xbf16>
    %45 = vector.shape_cast %44 : vector<1x16x16xbf16> to vector<16x16xbf16>
    %46 = vector.shape_cast %43 : vector<16x16xbf16> to vector<1x16x16xbf16>
    tpu.vector_store %arg4[%c4_35, %c0_36, %c0_37], %46 {strides = array<i32>} : memref<8x16x16xbf16, #tpu.memory_space<vmem>>, vector<1x16x16xbf16>,
    %c5 = arith.constant 5 : index
    %c0_38 = arith.constant 0 : index
    %c0_39 = arith.constant 0 : index
    %47 = vector.load %arg1[%c5, %c0_38, %c0_39] : memref<8x8x8xbf16, #tpu.memory_space<vmem>>, vector<1x8x8xbf16>
    %48 = vector.shape_cast %47 : vector<1x8x8xbf16> to vector<8x8xbf16>
    %cst_40 = arith.constant dense<0.000000e+00> : vector<16x8xf32>
    %49 = tpu.matmul %0, %48, %cst_40 {dimension_numbers = #tpu.dot_dimension_numbers<[1], [0], [0], [1], [0, 0, 1, 1], [], []>} : vector<16x8xbf16>, vector<8x8xbf16>, vector<16x8xf32> -> vector<16x8xf32>
    %50 = arith.truncf %49 : vector<16x8xf32> to vector<16x8xbf16>
    %cst_41 = arith.constant dense<0.000000e+00> : vector<16x16xf32>
    %51 = tpu.matmul %50, %1, %cst_41 {dimension_numbers = #tpu.dot_dimension_numbers<[1], [0], [0], [1], [0, 0, 1, 1], [], []>} : vector<16x8xbf16>, vector<8x16xbf16>, vector<16x16xf32> -> vector<16x16xf32>
    %52 = arith.truncf %51 : vector<16x16xf32> to vector<16x16xbf16>
    %c5_42 = arith.constant 5 : index
    %c0_43 = arith.constant 0 : index
    %c0_44 = arith.constant 0 : index
    %53 = vector.load %arg4[%c5_42, %c0_43, %c0_44] : memref<8x16x16xbf16, #tpu.memory_space<vmem>>, vector<1x16x16xbf16>
    %54 = vector.shape_cast %53 : vector<1x16x16xbf16> to vector<16x16xbf16>
    %55 = vector.shape_cast %52 : vector<16x16xbf16> to vector<1x16x16xbf16>
    tpu.vector_store %arg4[%c5_42, %c0_43, %c0_44], %55 {strides = array<i32>} : memref<8x16x16xbf16, #tpu.memory_space<vmem>>, vector<1x16x16xbf16>,
    %c6 = arith.constant 6 : index
    %c0_45 = arith.constant 0 : index
    %c0_46 = arith.constant 0 : index
    %56 = vector.load %arg1[%c6, %c0_45, %c0_46] : memref<8x8x8xbf16, #tpu.memory_space<vmem>>, vector<1x8x8xbf16>
    %57 = vector.shape_cast %56 : vector<1x8x8xbf16> to vector<8x8xbf16>
    %cst_47 = arith.constant dense<0.000000e+00> : vector<16x8xf32>
    %58 = tpu.matmul %0, %57, %cst_47 {dimension_numbers = #tpu.dot_dimension_numbers<[1], [0], [0], [1], [0, 0, 1, 1], [], []>} : vector<16x8xbf16>, vector<8x8xbf16>, vector<16x8xf32> -> vector<16x8xf32>
    %59 = arith.truncf %58 : vector<16x8xf32> to vector<16x8xbf16>
    %cst_48 = arith.constant dense<0.000000e+00> : vector<16x16xf32>
    %60 = tpu.matmul %59, %1, %cst_48 {dimension_numbers = #tpu.dot_dimension_numbers<[1], [0], [0], [1], [0, 0, 1, 1], [], []>} : vector<16x8xbf16>, vector<8x16xbf16>, vector<16x16xf32> -> vector<16x16xf32>
    %61 = arith.truncf %60 : vector<16x16xf32> to vector<16x16xbf16>
    %c6_49 = arith.constant 6 : index
    %c0_50 = arith.constant 0 : index
    %c0_51 = arith.constant 0 : index
    %62 = vector.load %arg4[%c6_49, %c0_50, %c0_51] : memref<8x16x16xbf16, #tpu.memory_space<vmem>>, vector<1x16x16xbf16>
    %63 = vector.shape_cast %62 : vector<1x16x16xbf16> to vector<16x16xbf16>
    %64 = vector.shape_cast %61 : vector<16x16xbf16> to vector<1x16x16xbf16>
    tpu.vector_store %arg4[%c6_49, %c0_50, %c0_51], %64 {strides = array<i32>} : memref<8x16x16xbf16, #tpu.memory_space<vmem>>, vector<1x16x16xbf16>,
    %c7 = arith.constant 7 : index
    %c0_52 = arith.constant 0 : index
    %c0_53 = arith.constant 0 : index
    %65 = vector.load %arg1[%c7, %c0_52, %c0_53] : memref<8x8x8xbf16, #tpu.memory_space<vmem>>, vector<1x8x8xbf16>
    %66 = vector.shape_cast %65 : vector<1x8x8xbf16> to vector<8x8xbf16>
    %cst_54 = arith.constant dense<0.000000e+00> : vector<16x8xf32>
    %67 = tpu.matmul %0, %66, %cst_54 {dimension_numbers = #tpu.dot_dimension_numbers<[1], [0], [0], [1], [0, 0, 1, 1], [], []>} : vector<16x8xbf16>, vector<8x8xbf16>, vector<16x8xf32> -> vector<16x8xf32>
    %68 = arith.truncf %67 : vector<16x8xf32> to vector<16x8xbf16>
    %cst_55 = arith.constant dense<0.000000e+00> : vector<16x16xf32>
    %69 = tpu.matmul %68, %1, %cst_55 {dimension_numbers = #tpu.dot_dimension_numbers<[1], [0], [0], [1], [0, 0, 1, 1], [], []>} : vector<16x8xbf16>, vector<8x16xbf16>, vector<16x16xf32> -> vector<16x16xf32>
    %70 = arith.truncf %69 : vector<16x16xf32> to vector<16x16xbf16>
    %c7_56 = arith.constant 7 : index
    %c0_57 = arith.constant 0 : index
    %c0_58 = arith.constant 0 : index
    %71 = vector.load %arg4[%c7_56, %c0_57, %c0_58] : memref<8x16x16xbf16, #tpu.memory_space<vmem>>, vector<1x16x16xbf16>
    %72 = vector.shape_cast %71 : vector<1x16x16xbf16> to vector<16x16xbf16>
    %73 = vector.shape_cast %70 : vector<16x16xbf16> to vector<1x16x16xbf16>
    tpu.vector_store %arg4[%c7_56, %c0_57, %c0_58], %73 {strides = array<i32>} : memref<8x16x16xbf16, #tpu.memory_space<vmem>>, vector<1x16x16xbf16>,
    return
  }
  func.func @transform_0(%arg0: i32) -> (i32, i32, i32) {
    %c0_i32 = arith.constant 0 : i32
    %c0_i32_0 = arith.constant 0 : i32
    %c0_i32_1 = arith.constant 0 : i32
    return %arg0, %c0_i32, %c0_i32_0 : i32, i32, i32
  }
  func.func @transform_1(%arg0: i32) -> (i32, i32) {
    %c0_i32 = arith.constant 0 : i32
    %c0_i32_0 = arith.constant 0 : i32
    %c0_i32_1 = arith.constant 0 : i32
    return %c0_i32, %c0_i32_0 : i32, i32
  }
  func.func @transform_2(%arg0: i32) -> (i32, i32) {
    %c0_i32 = arith.constant 0 : i32
    %c0_i32_0 = arith.constant 0 : i32
    %c0_i32_1 = arith.constant 0 : i32
    return %c0_i32, %c0_i32_0 : i32, i32
  }
  func.func @transform_3(%arg0: i32) -> (i32, i32, i32) {
    %c0_i32 = arith.constant 0 : i32
    %c0_i32_0 = arith.constant 0 : i32
    %c0_i32_1 = arith.constant 0 : i32
    return %arg0, %c0_i32, %c0_i32_0 : i32, i32, i32
  }
}

</mosaic_0001>

<bundles_post_ra>
// kernel: tpu_custom_call.1
= control target key start
LH: loop header
LB: loop body
LE: loop exit
PB: predicated region body
PF: predicated region fallthrough
CT: control target
= control target key end

     0   :  { %s1318_s12 = smov 0   ;;  %s1472_s0 = inlined_call_operand.vmem [shape: bf16[40,8,8], index: 0, kind: input, shape index: {}]   ;;  %s1473_s1 = inlined_call_operand.vmem [shape: bf16[16,8], index: 1, kind: input, shape index: {}]   ;;  %s1474_s2 = inlined_call_operand.vmem [shape: bf16[8,16], index: 2, kind: input, shape index: {}]   ;;  %s1475_s3 = inlined_call_operand.vmem [shape: bf16[40,16,16], index: 3, kind: output, shape index: {}]  }
   0x1 LB: > { %s1066_s13 = sadd.s32 4294967295, %s1294_s12   ;;  %p1070_p0 = scmp.ge.s32.totalorder %s1294_s12, 1  ;;  %s1294_s12 = sphi %s1318_s12, %s13_s12  }
   0x2   : > { %p138_p1 = scmp.lt.s32.totalorder %s1294_s12, 6 }
   0x4   : > { %p139_p2 = pnand %p1070_p0, %p138_p1 }
   0x5   : > { %s1071_s14 = sshll.u32 (!%p139_p2), %s1066_s13, 3 }
   0x6   : > { %142 = sbr.rel (%p139_p2) target bundleno = 474 (0x1da), region = 32  ;;  %p164_p3 = scmp.lt.s32.totalorder (!%p139_p2), %s1071_s14, 39 }
   0xb   : > { %v1296_v0 = vmov 0.0   ;;  %vm1297_vm0 = vmmov 0   ;;  %s1477_s14 = smov (!%p164_p3, %s1071_s14), 39  ;;  %vm190_vm1 = vcmask 1043456   ;;  %v1287_v4 = vld [vmem:[%s1473_s1] sm:$0xff]   ;;  %vm186_vm2 = vcmask 64512  }
   0xc   : > { %1181 = vmatprep.subr.bf16.mxu0 %v1296_v0  ;;  %1183 = vmatprep.mubr.msk.bf16.mxu0 %vm1297_vm0, %v1296_v0  ;;  %s1072_s15 = sshll.u32 %s1477_s14, 2  ;;  %v179_v18 = vld [vmem:[%s1474_s2] sm:$0xf]  ;;  %s1132_s23 = sshll.u32 %s1477_s14, 3  ;;  %vm291_vm3 = vcmask 125952  }
   0xd   : > { %1187 = vmatprep.subr.bf16.mxu1 %v1296_v0  ;;  %1189 = vmatprep.mubr.msk.bf16.mxu1 %vm1297_vm0, %v1296_v0  ;;  %s1338_s18 = scalar_lea.vmem %s1472_s0, %s1072_s15  ;;  %v1392_v19 = vsel %vm190_vm1, %v179_v18, 0  ;;  %s1435_s26 = scalar_lea.vmem %s1475_s3, %s1132_s23 }
   0xe   : > { %v180_v1 = vld [vmem:[%s1338_s18] sm:$0xf]  ;;  %v1081_v2 = vld [vmem:[%s1338_s18 + $0x4] sm:$0xf]  ;;  %v1088_v6 = vld [vmem:[%s1338_s18 + $0x8] sm:$0xf]  ;;  %1188 = vmatpush3.bf16.msra.mxu1 %v1392_v19 }
   0xf   : > { %v192_v3 = vsel %vm190_vm1, %v180_v1, 0  ;;  %v297_v5 = vsel %vm190_vm1, %v1081_v2, 0  ;;  %v399_v7 = vsel %vm190_vm1, %v1088_v6, 0  ;;  %v1095_v8 = vld [vmem:[%s1338_s18 + $0xc] sm:$0xf]  ;;  %1199 = vmatprep.subr.bf16.mxu1 %v1296_v0 }
  0x10   : > { %1182 = vmatpush3.bf16.msra.mxu0 %v192_v3  ;;  %v501_v9 = vsel %vm190_vm1, %v1095_v8, 0  ;;  %v1102_v10 = vld [vmem:[%s1338_s18 + $0x10] sm:$0xf]  ;;  %v1109_v12 = vld [vmem:[%s1338_s18 + $0x14] sm:$0xf] }
  0x11   : > { %1193 = vmatprep.subr.bf16.mxu0 %v1296_v0  ;;  %v603_v11 = vsel %vm190_vm1, %v1102_v10, 0  ;;  %v705_v13 = vsel %vm190_vm1, %v1109_v12, 0  ;;  %v1116_v14 = vld [vmem:[%s1338_s18 + $0x18] sm:$0xf]  ;;  %v1123_v16 = vld [vmem:[%s1338_s18 + $0x1c] sm:$0xf] }
  0x12   : > { %v807_v15 = vsel %vm190_vm1, %v1116_v14, 0  ;;  %v909_v17 = vsel %vm190_vm1, %v1123_v16, 0 }
  0x13   : > { %1184 = vmatmul.mubr.msk.bf16.vlgmr.msra.gmra.mxu0 %vm186_vm2, %v1287_v4 }
  0x14   : > { %1194 = vmatpush3.bf16.msra.mxu0 %v297_v5  ;;  %1195 = vmatprep.mubr.msk.bf16.mxu0 %vm1297_vm0, %v1296_v0 }
  0x15   : > { %1205 = vmatprep.subr.bf16.mxu0 %v1296_v0 }
  0x1b   : > { %1196 = vmatmul.mubr.msk.bf16.vlgmr.msra.gmra.mxu0 %vm186_vm2, %v1287_v4 }
  0x1c   : > { %1206 = vmatpush3.bf16.msra.mxu0 %v399_v7  ;;  %1207 = vmatprep.mubr.msk.bf16.mxu0 %vm1297_vm0, %v1296_v0 }
  0x1d   : > { %1217 = vmatprep.subr.bf16.mxu0 %v1296_v0 }
  0x23   : > { %1208 = vmatmul.mubr.msk.bf16.vlgmr.msra.gmra.mxu0 %vm186_vm2, %v1287_v4 }
  0x24   : > { %1218 = vmatpush3.bf16.msra.mxu0 %v501_v9  ;;  %1219 = vmatprep.mubr.msk.bf16.mxu0 %vm1297_vm0, %v1296_v0 }
  0x25   : > { %1229 = vmatprep.subr.bf16.mxu0 %v1296_v0 }
  0x2b   : > { %1220 = vmatmul.mubr.msk.bf16.vlgmr.msra.gmra.mxu0 %vm186_vm2, %v1287_v4 }
  0x2c   : > { %1230 = vmatpush3.bf16.msra.mxu0 %v603_v11  ;;  %1231 = vmatprep.mubr.msk.bf16.mxu0 %vm1297_vm0, %v1296_v0 }
  0x2d   : > { %1241 = vmatprep.subr.bf16.mxu0 %v1296_v0 }
  0x33   : > { %1232 = vmatmul.mubr.msk.bf16.vlgmr.msra.gmra.mxu0 %vm186_vm2, %v1287_v4 }
  0x34   : > { %1242 = vmatpush3.bf16.msra.mxu0 %v705_v13  ;;  %1243 = vmatprep.mubr.msk.bf16.mxu0 %vm1297_vm0, %v1296_v0 }
  0x35   : > { %1253 = vmatprep.subr.bf16.mxu0 %v1296_v0 }
  0x3b   : > { %1244 = vmatmul.mubr.msk.bf16.vlgmr.msra.gmra.mxu0 %vm186_vm2, %v1287_v4 }
  0x3c   : > { %1254 = vmatpush3.bf16.msra.mxu0 %v807_v15  ;;  %1255 = vmatprep.mubr.msk.bf16.mxu0 %vm1297_vm0, %v1296_v0 }
  0x3d   : > { %1265 = vmatprep.subr.bf16.mxu0 %v1296_v0 }
  0x43   : > { %1256 = vmatmul.mubr.msk.bf16.vlgmr.msra.gmra.mxu0 %vm186_vm2, %v1287_v4 }
  0x44   : > { %1266 = vmatpush3.bf16.msra.mxu0 %v909_v17  ;;  %1267 = vmatprep.mubr.msk.bf16.mxu0 %vm1297_vm0, %v1296_v0 }
  0x4b   : > { %1268 = vmatmul.mubr.msk.bf16.vlgmr.msra.gmra.mxu0 %vm186_vm2, %v1287_v4 }
  0xd3   : > { %v228_v20 = vpop.f32.mrf.mxu0 }
  0xd5   : > { %v1185_v21 = vpop.f32.mrf.mxu0 }
  0xd7   : > { %v231_v22 = vpop.f32.mrf.mxu0 }
  0xd8   : > { %v235_v23 = vpack.c.bf16 %v231_v22, %v228_v20 }
  0xd9   : > { %v1186_v24 = vpop.f32.mrf.mxu0 }
  0xda   : > { %1190 = vmatmul.mubr.msk.bf16.vlgmr.msra.gmra.mxu1 %vm186_vm2, %v235_v23 }
  0xdb   : > { %v333_v25 = vpop.f32.mrf.mxu0  ;;  %1200 = vmatpush3.bf16.msra.mxu1 %v1392_v19  ;;  %1201 = vmatprep.mubr.msk.bf16.mxu1 %vm1297_vm0, %v1296_v0 }
  0xdc   : > { %1211 = vmatprep.subr.bf16.mxu1 %v1296_v0 }
  0xdd   : > { %v1197_v26 = vpop.f32.mrf.mxu0 }
  0xdf   : > { %v336_v27 = vpop.f32.mrf.mxu0 }
  0xe0   : > { %v340_v28 = vpack.c.bf16 %v336_v27, %v333_v25 }
  0xe1   : > { %v1198_v29 = vpop.f32.mrf.mxu0 }
  0xe2   : > { %1202 = vmatmul.mubr.msk.bf16.vlgmr.msra.gmra.mxu1 %vm186_vm2, %v340_v28 }
  0xe3   : > { %v435_v30 = vpop.f32.mrf.mxu0  ;;  %1212 = vmatpush3.bf16.msra.mxu1 %v1392_v19  ;;  %1213 = vmatprep.mubr.msk.bf16.mxu1 %vm1297_vm0, %v1296_v0 }
  0xe4   : > { %1223 = vmatprep.subr.bf16.mxu1 %v1296_v0 }
  0xe5   : > { %v1209_v31 = vpop.f32.mrf.mxu0 }
  0xe7   : > { %v438_v32 = vpop.f32.mrf.mxu0 }
  0xe8   : > { %v442_v33 = vpack.c.bf16 %v438_v32, %v435_v30 }
  0xe9   : > { %v1210_v34 = vpop.f32.mrf.mxu0 }
  0xea   : > { %1214 = vmatmul.mubr.msk.bf16.vlgmr.msra.gmra.mxu1 %vm186_vm2, %v442_v33 }
  0xeb   : > { %v537_v35 = vpop.f32.mrf.mxu0  ;;  %1224 = vmatpush3.bf16.msra.mxu1 %v1392_v19  ;;  %1225 = vmatprep.mubr.msk.bf16.mxu1 %vm1297_vm0, %v1296_v0 }
  0xec   : > { %1235 = vmatprep.subr.bf16.mxu1 %v1296_v0 }
  0xed   : > { %v1221_v36 = vpop.f32.mrf.mxu0 }
  0xef   : > { %v540_v37 = vpop.f32.mrf.mxu0 }
  0xf0   : > { %v544_v38 = vpack.c.bf16 %v540_v37, %v537_v35 }
  0xf1   : > { %v1222_v39 = vpop.f32.mrf.mxu0 }
  0xf2   : > { %1226 = vmatmul.mubr.msk.bf16.vlgmr.msra.gmra.mxu1 %vm186_vm2, %v544_v38 }
  0xf3   : > { %v639_v40 = vpop.f32.mrf.mxu0  ;;  %1236 = vmatpush3.bf16.msra.mxu1 %v1392_v19  ;;  %1237 = vmatprep.mubr.msk.bf16.mxu1 %vm1297_vm0, %v1296_v0 }
  0xf4   : > { %1247 = vmatprep.subr.bf16.mxu1 %v1296_v0 }
  0xf5   : > { %v1233_v41 = vpop.f32.mrf.mxu0 }
  0xf7   : > { %v642_v42 = vpop.f32.mrf.mxu0 }
  0xf8   : > { %v646_v43 = vpack.c.bf16 %v642_v42, %v639_v40 }
  0xf9   : > { %v1234_v44 = vpop.f32.mrf.mxu0 }
  0xfa   : > { %1238 = vmatmul.mubr.msk.bf16.vlgmr.msra.gmra.mxu1 %vm186_vm2, %v646_v43 }
  0xfb   : > { %v741_v45 = vpop.f32.mrf.mxu0  ;;  %1248 = vmatpush3.bf16.msra.mxu1 %v1392_v19  ;;  %1249 = vmatprep.mubr.msk.bf16.mxu1 %vm1297_vm0, %v1296_v0 }
  0xfc   : > { %1259 = vmatprep.subr.bf16.mxu1 %v1296_v0 }
  0xfd   : > { %v1245_v46 = vpop.f32.mrf.mxu0 }
  0xff   : > { %v744_v47 = vpop.f32.mrf.mxu0 }
 0x100   : > { %v748_v48 = vpack.c.bf16 %v744_v47, %v741_v45 }
 0x101   : > { %v1246_v49 = vpop.f32.mrf.mxu0 }
 0x102   : > { %1250 = vmatmul.mubr.msk.bf16.vlgmr.msra.gmra.mxu1 %vm186_vm2, %v748_v48 }
 0x103   : > { %v843_v50 = vpop.f32.mrf.mxu0  ;;  %1260 = vmatpush3.bf16.msra.mxu1 %v1392_v19  ;;  %1261 = vmatprep.mubr.msk.bf16.mxu1 %vm1297_vm0, %v1296_v0 }
 0x104   : > { %1271 = vmatprep.subr.bf16.mxu1 %v1296_v0 }
 0x105   : > { %v1257_v51 = vpop.f32.mrf.mxu0 }
 0x107   : > { %v846_v52 = vpop.f32.mrf.mxu0 }
 0x108   : > { %v850_v53 = vpack.c.bf16 %v846_v52, %v843_v50 }
 0x109   : > { %v1258_v54 = vpop.f32.mrf.mxu0 }
 0x10a   : > { %1262 = vmatmul.mubr.msk.bf16.vlgmr.msra.gmra.mxu1 %vm186_vm2, %v850_v53 }
 0x10b   : > { %v945_v55 = vpop.f32.mrf.mxu0  ;;  %1272 = vmatpush3.bf16.msra.mxu1 %v1392_v19  ;;  %1273 = vmatprep.mubr.msk.bf16.mxu1 %vm1297_vm0, %v1296_v0 }
 0x10d   : > { %v1269_v56 = vpop.f32.mrf.mxu0 }
 0x10f   : > { %v948_v57 = vpop.f32.mrf.mxu0 }
 0x110   : > { %v952_v58 = vpack.c.bf16 %v948_v57, %v945_v55 }
 0x111   : > { %v1270_v59 = vpop.f32.mrf.mxu0 }
 0x112   : > { %1274 = vmatmul.mubr.msk.bf16.vlgmr.msra.gmra.mxu1 %vm186_vm2, %v952_v58 }
 0x19a   : > { %v276_v60 = vpop.f32.mrf.mxu1 }
 0x19b   : > { %v1133_v61 = vpack.c.bf16 %v276_v60, %v276_v60 }
 0x19c   : > { %v1191_v62 = vpop.f32.mrf.mxu1 }
 0x19d   : > { %292 = vst.msk [vmem:[%s1435_s26] sm:$0xf] %vm291_vm3, %v1133_v61 }
 0x19e   : > { %v279_v63 = vpop.f32.mrf.mxu1 }
 0x19f   : > { %v1134_v0 = vpack.c.bf16 %v279_v63, %v279_v63 }
 0x1a0   : > { %v1192_v1 = vpop.f32.mrf.mxu1 }
 0x1a1   : > { %293 = vst.msk [vmem:[%s1435_s26 + $0x4] sm:$0xf] %vm291_vm3, %v1134_v0 }
 0x1a2   : > { %v378_v2 = vpop.f32.mrf.mxu1 }
 0x1a3   : > { %v1135_v3 = vpack.c.bf16 %v378_v2, %v378_v2 }
 0x1a4   : > { %v1203_v4 = vpop.f32.mrf.mxu1 }
 0x1a5   : > { %1086 = vst.msk [vmem:[%s1435_s26 + $0x8] sm:$0xf] %vm291_vm3, %v1135_v3 }
 0x1a6   : > { %v381_v5 = vpop.f32.mrf.mxu1 }
 0x1a7   : > { %v1136_v6 = vpack.c.bf16 %v381_v5, %v381_v5 }
 0x1a8   : > { %v1204_v7 = vpop.f32.mrf.mxu1 }
 0x1a9   : > { %1087 = vst.msk [vmem:[%s1435_s26 + $0xc] sm:$0xf] %vm291_vm3, %v1136_v6 }
 0x1aa   : > { %v480_v8 = vpop.f32.mrf.mxu1 }
 0x1ab   : > { %v1137_v9 = vpack.c.bf16 %v480_v8, %v480_v8 }
 0x1ac   : > { %v1215_v10 = vpop.f32.mrf.mxu1 }
 0x1ad   : > { %1093 = vst.msk [vmem:[%s1435_s26 + $0x10] sm:$0xf] %vm291_vm3, %v1137_v9 }
 0x1ae   : > { %v483_v11 = vpop.f32.mrf.mxu1 }
 0x1af   : > { %v1138_v12 = vpack.c.bf16 %v483_v11, %v483_v11 }
 0x1b0   : > { %v1216_v13 = vpop.f32.mrf.mxu1 }
 0x1b1   : > { %1094 = vst.msk [vmem:[%s1435_s26 + $0x14] sm:$0xf] %vm291_vm3, %v1138_v12 }
 0x1b2   : > { %v582_v14 = vpop.f32.mrf.mxu1 }
 0x1b3   : > { %v1139_v15 = vpack.c.bf16 %v582_v14, %v582_v14 }
 0x1b4   : > { %v1227_v16 = vpop.f32.mrf.mxu1 }
 0x1b5   : > { %1100 = vst.msk [vmem:[%s1435_s26 + $0x18] sm:$0xf] %vm291_vm3, %v1139_v15 }
 0x1b6   : > { %v585_v17 = vpop.f32.mrf.mxu1 }
 0x1b7   : > { %v1140_v18 = vpack.c.bf16 %v585_v17, %v585_v17 }
 0x1b8   : > { %v1228_v19 = vpop.f32.mrf.mxu1 }
 0x1b9   : > { %1101 = vst.msk [vmem:[%s1435_s26 + $0x1c] sm:$0xf] %vm291_vm3, %v1140_v18 }
 0x1ba   : > { %v684_v20 = vpop.f32.mrf.mxu1 }
 0x1bb   : > { %v1141_v21 = vpack.c.bf16 %v684_v20, %v684_v20 }
 0x1bc   : > { %v1239_v22 = vpop.f32.mrf.mxu1 }
 0x1bd   : > { %1107 = vst.msk [vmem:[%s1435_s26 + $0x20] sm:$0xf] %vm291_vm3, %v1141_v21 }
 0x1be   : > { %v687_v23 = vpop.f32.mrf.mxu1 }
 0x1bf   : > { %v1142_v24 = vpack.c.bf16 %v687_v23, %v687_v23 }
 0x1c0   : > { %v1240_v25 = vpop.f32.mrf.mxu1 }
 0x1c1   : > { %1108 = vst.msk [vmem:[%s1435_s26 + $0x24] sm:$0xf] %vm291_vm3, %v1142_v24 }
 0x1c2   : > { %v786_v26 = vpop.f32.mrf.mxu1 }
 0x1c3   : > { %v1143_v27 = vpack.c.bf16 %v786_v26, %v786_v26 }
 0x1c4   : > { %v1251_v28 = vpop.f32.mrf.mxu1 }
 0x1c5   : > { %1114 = vst.msk [vmem:[%s1435_s26 + $0x28] sm:$0xf] %vm291_vm3, %v1143_v27 }
 0x1c6   : > { %v789_v29 = vpop.f32.mrf.mxu1 }
 0x1c7   : > { %v1144_v30 = vpack.c.bf16 %v789_v29, %v789_v29 }
 0x1c8   : > { %v1252_v31 = vpop.f32.mrf.mxu1 }
 0x1c9   : > { %1115 = vst.msk [vmem:[%s1435_s26 + $0x2c] sm:$0xf] %vm291_vm3, %v1144_v30 }
 0x1ca   : > { %v888_v32 = vpop.f32.mrf.mxu1 }
 0x1cb   : > { %v1145_v33 = vpack.c.bf16 %v888_v32, %v888_v32 }
 0x1cc   : > { %v1263_v34 = vpop.f32.mrf.mxu1 }
 0x1cd   : > { %1121 = vst.msk [vmem:[%s1435_s26 + $0x30] sm:$0xf] %vm291_vm3, %v1145_v33 }
 0x1ce   : > { %v891_v35 = vpop.f32.mrf.mxu1 }
 0x1cf   : > { %v1146_v36 = vpack.c.bf16 %v891_v35, %v891_v35 }
 0x1d0   : > { %v1264_v37 = vpop.f32.mrf.mxu1 }
 0x1d1   : > { %1122 = vst.msk [vmem:[%s1435_s26 + $0x34] sm:$0xf] %vm291_vm3, %v1146_v36 }
 0x1d2   : > { %v990_v38 = vpop.f32.mrf.mxu1 }
 0x1d3   : > { %v1147_v39 = vpack.c.bf16 %v990_v38, %v990_v38 }
 0x1d4   : > { %v1275_v40 = vpop.f32.mrf.mxu1 }
 0x1d5   : > { %1128 = vst.msk [vmem:[%s1435_s26 + $0x38] sm:$0xf] %vm291_vm3, %v1147_v39 }
 0x1d6   : > { %v993_v41 = vpop.f32.mrf.mxu1 }
 0x1d7   : > { %v1148_v42 = vpack.c.bf16 %v993_v41, %v993_v41 }
 0x1d8   : > { %v1276_v43 = vpop.f32.mrf.mxu1 }
 0x1d9   : > { %1129 = vst.msk [vmem:[%s1435_s26 + $0x3c] sm:$0xf] %vm291_vm3, %v1148_v42 }
 0x1da PF: > { %s13_s12 = sadd.s32 1, %s1294_s12  }
 0x1db   : > { %p10_p4 = scmp.ge.s32.totalorder %s13_s12, 7  }
 0x1dd   :  { %12 = sbr.rel (!%p10_p4) target bundleno = 1 (0x1), region = 76 }

</bundles_post_ra>
